<compile_context>
chip_gen: v7x
topology: tpu7x:2x2x1
jax: 0.10.0
libtpu: 0.0.40
codegen_flags: <defaults>
</compile_context>

<pallas_src>
import jax
import jax.numpy as jnp
from jax.experimental import pallas as pl
from jax.experimental.pallas import tpu as pltpu


def _block_kernel(p_ref, x_ref, o_ref):
    """Fused conv1x1 -> ReLU -> conv1x1 (+ constant padding rings) for one image.

    p_ref: SMEM (27,) f32 = [w1 (9, out-major) | b1 (3) | w2 (9) | b2 (3) | ring2 (3)]
    x_ref: VMEM (3, H, W)       input image (dense 2-D per channel)
    o_ref: VMEM (3, H+4, W+4)   full output image, rings included
    """
    C, H, W = x_ref.shape
    Ho, Wo = H + 4, W + 4
    f32 = jnp.float32
    odtype = o_ref.dtype

    def w1(o, i):
        return p_ref[3 * o + i]

    def b1(o):
        return p_ref[9 + o]

    def w2(o, i):
        return p_ref[12 + 3 * o + i]

    def b2(o):
        return p_ref[21 + o]

    def ring2(o):
        return p_ref[24 + o]

    x0 = x_ref[0]
    x1 = x_ref[1]
    x2 = x_ref[2]
    if x0.dtype != f32:  # no-op cast removed for f32 inputs (trace-time check)
        x0, x1, x2 = x0.astype(f32), x1.astype(f32), x2.astype(f32)

    # conv1 + ReLU : VPU broadcast FMAs on dense (H, W) tiles
    h0 = jnp.maximum(w1(0, 0) * x0 + w1(0, 1) * x1 + w1(0, 2) * x2 + b1(0), 0.0)
    h1 = jnp.maximum(w1(1, 0) * x0 + w1(1, 1) * x1 + w1(1, 2) * x2 + b1(1), 0.0)
    h2 = jnp.maximum(w1(2, 0) * x0 + w1(2, 1) * x1 + w1(2, 2) * x2 + b1(2), 0.0)

    # conv2 + ring assembly, one output channel at a time
    for c in range(C):
        y = w2(c, 0) * h0 + w2(c, 1) * h1 + w2(c, 2) * h2 + b2(c)   # (H, W) interior
        if y.dtype != odtype:
            y = y.astype(odtype)
        # outer ring value everywhere, then second-ring frame, then interior.
        # Overlapping VMEM stores are cheap; HBM still sees a single writeback.
        o_ref[c, :, :] = jnp.full((Ho, Wo), b2(c), odtype)
        o_ref[c, 1:Ho - 1, 1:Wo - 1] = jnp.full((Ho - 2, Wo - 2), ring2(c), odtype)
        o_ref[c, 2:Ho - 2, 2:Wo - 2] = y


@jax.jit
def block_forward(x_nchw, w1, b1, w2, b2):
    """Forward pass of `Block`.

    Args:
      x_nchw: (N, 3, H, W) input (PyTorch NCHW convention).
      w1, w2: (3, 3, 1, 1) conv weights (out_ch, in_ch, 1, 1).
      b1, b2: (3,) biases.
    Returns:
      (N, 3, H+4, W+4), matching Conv2d(k=1, pad=1) -> ReLU -> Conv2d(k=1, pad=1).
    """
    N, C, H, W = x_nchw.shape
    assert C == 3, "Block is defined for 3 channels"
    Ho, Wo = H + 4, W + 4
    dtype = x_nchw.dtype

    # Pointwise matrices / biases + precomputed second-ring constant, packed
    # into a single small SMEM vector.
    w1m = w1[:, :, 0, 0].astype(jnp.float32)                  # (out, in)
    w2m = w2[:, :, 0, 0].astype(jnp.float32)
    b1f = b1.astype(jnp.float32)
    b2f = b2.astype(jnp.float32)
    r1 = w2m @ jnp.maximum(b1f, 0.0) + b2f                    # (3,) ring-2 value
    params = jnp.concatenate(
        [w1m.reshape(-1), b1f, w2m.reshape(-1), b2f, r1]).astype(jnp.float32)  # (27,)

    return pl.pallas_call(
        _block_kernel,
        out_shape=jax.ShapeDtypeStruct((N, C, Ho, Wo), dtype),
        grid=(N,),
        in_specs=[
            pl.BlockSpec(memory_space=pltpu.MemorySpace.SMEM),         # params
            pl.BlockSpec((None, C, H, W), lambda n: (n, 0, 0, 0)),     # one image
        ],
        out_specs=pl.BlockSpec((None, C, Ho, Wo), lambda n: (n, 0, 0, 0)),
        compiler_params=pltpu.CompilerParams(
            dimension_semantics=("parallel",)),
    )(params, x_nchw)


def _reference(x_nchw, w1, b1, w2, b2):
    """Pure-JAX reference using lax conv, NCHW like PyTorch."""
    dn = jax.lax.conv_dimension_numbers(x_nchw.shape, w1.shape, ("NCHW", "OIHW", "NCHW"))
    y = jax.lax.conv_general_dilated(x_nchw, w1, (1, 1), ((1, 1), (1, 1)),
                                     dimension_numbers=dn)
    y = y + b1.reshape(1, -1, 1, 1)
    y = jnp.maximum(y, 0.0)
    y = jax.lax.conv_general_dilated(y, w2, (1, 1), ((1, 1), (1, 1)),
                                     dimension_numbers=dn)
    y = y + b2.reshape(1, -1, 1, 1)
    return y


if __name__ == "__main__":
    key = jax.random.PRNGKey(0)
    k_x, k_w1, k_b1, k_w2, k_b2 = jax.random.split(key, 5)

    N, C, H, W = 2, 3, 16, 16
    x = jax.random.normal(k_x, (N, C, H, W), dtype=jnp.float32)

    # Conv2d(3, 3, 1, 1) parameter shapes: weight (3,3,1,1), bias (3,)
    fan_in = C * 1 * 1
    bound = 1.0 / (fan_in ** 0.5)
    w1 = jax.random.uniform(k_w1, (3, 3, 1, 1), jnp.float32, -bound, bound)
    b1 = jax.random.uniform(k_b1, (3,), jnp.float32, -bound, bound)
    w2 = jax.random.uniform(k_w2, (3, 3, 1, 1), jnp.float32, -bound, bound)
    b2 = jax.random.uniform(k_b2, (3,), jnp.float32, -bound, bound)

    out = jax.block_until_ready(block_forward(x, w1, b1, w2, b2))
    ref = jax.block_until_ready(_reference(x, w1, b1, w2, b2))

    assert out.shape == (N, C, H + 4, W + 4), out.shape
    assert jnp.allclose(out, ref, atol=1e-5, rtol=1e-5), float(jnp.abs(out - ref).max())

    print("KERNEL_OK")
</pallas_src>

<mosaic_0001>
module attributes {stable_mosaic.version = 11 : i64} {
  func.func @_block_kernel(%arg0: i32, %arg1: memref<27xf32, #tpu.memory_space<smem>>, %arg2: memref<1x3x16x16xf32, #tpu.memory_space<vmem>>, %arg3: memref<1x3x20x20xf32, #tpu.memory_space<vmem>>) attributes {dimension_semantics = [#tpu.dimension_semantics<parallel>], iteration_bounds = array<i64: 2>, scalar_prefetch = 0 : i64, scratch_operands = 0 : i64, tpu.core_type = #tpu.core_type<tc>, window_params = [{transform_indices = @transform_0, window_bounds = array<i64: 27>}, {transform_indices = @transform_1, window_bounds = array<i64: 1, 3, 16, 16>}, {transform_indices = @transform_2, window_bounds = array<i64: 1, 3, 20, 20>}]} {
    %c0 = arith.constant 0 : index
    %c0_0 = arith.constant 0 : index
    %c0_1 = arith.constant 0 : index
    %c0_2 = arith.constant 0 : index
    %0 = vector.load %arg2[%c0, %c0_0, %c0_1, %c0_2] : memref<1x3x16x16xf32, #tpu.memory_space<vmem>>, vector<1x1x16x16xf32>
    %1 = vector.shape_cast %0 : vector<1x1x16x16xf32> to vector<16x16xf32>
    %c0_3 = arith.constant 0 : index
    %c1 = arith.constant 1 : index
    %c0_4 = arith.constant 0 : index
    %c0_5 = arith.constant 0 : index
    %2 = vector.load %arg2[%c0_3, %c1, %c0_4, %c0_5] : memref<1x3x16x16xf32, #tpu.memory_space<vmem>>, vector<1x1x16x16xf32>
    %3 = vector.shape_cast %2 : vector<1x1x16x16xf32> to vector<16x16xf32>
    %c0_6 = arith.constant 0 : index
    %c2 = arith.constant 2 : index
    %c0_7 = arith.constant 0 : index
    %c0_8 = arith.constant 0 : index
    %4 = vector.load %arg2[%c0_6, %c2, %c0_7, %c0_8] : memref<1x3x16x16xf32, #tpu.memory_space<vmem>>, vector<1x1x16x16xf32>
    %5 = vector.shape_cast %4 : vector<1x1x16x16xf32> to vector<16x16xf32>
    %c0_9 = arith.constant 0 : index
    %6 = memref.load %arg1[%c0_9] : memref<27xf32, #tpu.memory_space<smem>>
    %7 = vector.broadcast %6 : f32 to vector<16x16xf32>
    %8 = arith.mulf %7, %1 : vector<16x16xf32>
    %c1_10 = arith.constant 1 : index
    %9 = memref.load %arg1[%c1_10] : memref<27xf32, #tpu.memory_space<smem>>
    %10 = vector.broadcast %9 : f32 to vector<16x16xf32>
    %11 = arith.mulf %10, %3 : vector<16x16xf32>
    %12 = arith.addf %8, %11 : vector<16x16xf32>
    %c2_11 = arith.constant 2 : index
    %13 = memref.load %arg1[%c2_11] : memref<27xf32, #tpu.memory_space<smem>>
    %14 = vector.broadcast %13 : f32 to vector<16x16xf32>
    %15 = arith.mulf %14, %5 : vector<16x16xf32>
    %16 = arith.addf %12, %15 : vector<16x16xf32>
    %c9 = arith.constant 9 : index
    %17 = memref.load %arg1[%c9] : memref<27xf32, #tpu.memory_space<smem>>
    %18 = vector.broadcast %17 : f32 to vector<16x16xf32>
    %19 = arith.addf %16, %18 : vector<16x16xf32>
    %cst = arith.constant 0.000000e+00 : f32
    %20 = vector.broadcast %cst : f32 to vector<16x16xf32>
    %21 = arith.maximumf %19, %20 : vector<16x16xf32>
    %c3 = arith.constant 3 : index
    %22 = memref.load %arg1[%c3] : memref<27xf32, #tpu.memory_space<smem>>
    %23 = vector.broadcast %22 : f32 to vector<16x16xf32>
    %24 = arith.mulf %23, %1 : vector<16x16xf32>
    %c4 = arith.constant 4 : index
    %25 = memref.load %arg1[%c4] : memref<27xf32, #tpu.memory_space<smem>>
    %26 = vector.broadcast %25 : f32 to vector<16x16xf32>
    %27 = arith.mulf %26, %3 : vector<16x16xf32>
    %28 = arith.addf %24, %27 : vector<16x16xf32>
    %c5 = arith.constant 5 : index
    %29 = memref.load %arg1[%c5] : memref<27xf32, #tpu.memory_space<smem>>
    %30 = vector.broadcast %29 : f32 to vector<16x16xf32>
    %31 = arith.mulf %30, %5 : vector<16x16xf32>
    %32 = arith.addf %28, %31 : vector<16x16xf32>
    %c10 = arith.constant 10 : index
    %33 = memref.load %arg1[%c10] : memref<27xf32, #tpu.memory_space<smem>>
    %34 = vector.broadcast %33 : f32 to vector<16x16xf32>
    %35 = arith.addf %32, %34 : vector<16x16xf32>
    %cst_12 = arith.constant 0.000000e+00 : f32
    %36 = vector.broadcast %cst_12 : f32 to vector<16x16xf32>
    %37 = arith.maximumf %35, %36 : vector<16x16xf32>
    %c6 = arith.constant 6 : index
    %38 = memref.load %arg1[%c6] : memref<27xf32, #tpu.memory_space<smem>>
    %39 = vector.broadcast %38 : f32 to vector<16x16xf32>
    %40 = arith.mulf %39, %1 : vector<16x16xf32>
    %c7 = arith.constant 7 : index
    %41 = memref.load %arg1[%c7] : memref<27xf32, #tpu.memory_space<smem>>
    %42 = vector.broadcast %41 : f32 to vector<16x16xf32>
    %43 = arith.mulf %42, %3 : vector<16x16xf32>
    %44 = arith.addf %40, %43 : vector<16x16xf32>
    %c8 = arith.constant 8 : index
    %45 = memref.load %arg1[%c8] : memref<27xf32, #tpu.memory_space<smem>>
    %46 = vector.broadcast %45 : f32 to vector<16x16xf32>
    %47 = arith.mulf %46, %5 : vector<16x16xf32>
    %48 = arith.addf %44, %47 : vector<16x16xf32>
    %c11 = arith.constant 11 : index
    %49 = memref.load %arg1[%c11] : memref<27xf32, #tpu.memory_space<smem>>
    %50 = vector.broadcast %49 : f32 to vector<16x16xf32>
    %51 = arith.addf %48, %50 : vector<16x16xf32>
    %cst_13 = arith.constant 0.000000e+00 : f32
    %52 = vector.broadcast %cst_13 : f32 to vector<16x16xf32>
    %53 = arith.maximumf %51, %52 : vector<16x16xf32>
    %c12 = arith.constant 12 : index
    %54 = memref.load %arg1[%c12] : memref<27xf32, #tpu.memory_space<smem>>
    %55 = vector.broadcast %54 : f32 to vector<16x16xf32>
    %56 = arith.mulf %55, %21 : vector<16x16xf32>
    %c13 = arith.constant 13 : index
    %57 = memref.load %arg1[%c13] : memref<27xf32, #tpu.memory_space<smem>>
    %58 = vector.broadcast %57 : f32 to vector<16x16xf32>
    %59 = arith.mulf %58, %37 : vector<16x16xf32>
    %60 = arith.addf %56, %59 : vector<16x16xf32>
    %c14 = arith.constant 14 : index
    %61 = memref.load %arg1[%c14] : memref<27xf32, #tpu.memory_space<smem>>
    %62 = vector.broadcast %61 : f32 to vector<16x16xf32>
    %63 = arith.mulf %62, %53 : vector<16x16xf32>
    %64 = arith.addf %60, %63 : vector<16x16xf32>
    %c21 = arith.constant 21 : index
    %65 = memref.load %arg1[%c21] : memref<27xf32, #tpu.memory_space<smem>>
    %66 = vector.broadcast %65 : f32 to vector<16x16xf32>
    %67 = arith.addf %64, %66 : vector<16x16xf32>
    %c21_14 = arith.constant 21 : index
    %68 = memref.load %arg1[%c21_14] : memref<27xf32, #tpu.memory_space<smem>>
    %69 = vector.broadcast %68 : f32 to vector<20x20xf32>
    %c0_15 = arith.constant 0 : index
    %c0_16 = arith.constant 0 : index
    %c0_17 = arith.constant 0 : index
    %c0_18 = arith.constant 0 : index
    %70 = vector.load %arg3[%c0_15, %c0_16, %c0_17, %c0_18] : memref<1x3x20x20xf32, #tpu.memory_space<vmem>>, vector<1x1x20x20xf32>
    %71 = vector.shape_cast %70 : vector<1x1x20x20xf32> to vector<20x20xf32>
    %72 = vector.shape_cast %69 : vector<20x20xf32> to vector<1x1x20x20xf32>
    tpu.vector_store %arg3[%c0_15, %c0_16, %c0_17, %c0_18], %72 {strides = array<i32>} : memref<1x3x20x20xf32, #tpu.memory_space<vmem>>, vector<1x1x20x20xf32>,
    %c24 = arith.constant 24 : index
    %73 = memref.load %arg1[%c24] : memref<27xf32, #tpu.memory_space<smem>>
    %74 = vector.broadcast %73 : f32 to vector<18x18xf32>
    %c0_19 = arith.constant 0 : index
    %c0_20 = arith.constant 0 : index
    %c1_21 = arith.constant 1 : index
    %c1_22 = arith.constant 1 : index
    %75 = vector.load %arg3[%c0_19, %c0_20, %c1_21, %c1_22] : memref<1x3x20x20xf32, #tpu.memory_space<vmem>>, vector<1x1x18x18xf32>
    %76 = vector.shape_cast %75 : vector<1x1x18x18xf32> to vector<18x18xf32>
    %77 = vector.shape_cast %74 : vector<18x18xf32> to vector<1x1x18x18xf32>
    tpu.vector_store %arg3[%c0_19, %c0_20, %c1_21, %c1_22], %77 {strides = array<i32>} : memref<1x3x20x20xf32, #tpu.memory_space<vmem>>, vector<1x1x18x18xf32>,
    %c0_23 = arith.constant 0 : index
    %c0_24 = arith.constant 0 : index
    %c2_25 = arith.constant 2 : index
    %c2_26 = arith.constant 2 : index
    %78 = vector.load %arg3[%c0_23, %c0_24, %c2_25, %c2_26] : memref<1x3x20x20xf32, #tpu.memory_space<vmem>>, vector<1x1x16x16xf32>
    %79 = vector.shape_cast %78 : vector<1x1x16x16xf32> to vector<16x16xf32>
    %80 = vector.shape_cast %67 : vector<16x16xf32> to vector<1x1x16x16xf32>
    tpu.vector_store %arg3[%c0_23, %c0_24, %c2_25, %c2_26], %80 {strides = array<i32>} : memref<1x3x20x20xf32, #tpu.memory_space<vmem>>, vector<1x1x16x16xf32>,
    %c15 = arith.constant 15 : index
    %81 = memref.load %arg1[%c15] : memref<27xf32, #tpu.memory_space<smem>>
    %82 = vector.broadcast %81 : f32 to vector<16x16xf32>
    %83 = arith.mulf %82, %21 : vector<16x16xf32>
    %c16 = arith.constant 16 : index
    %84 = memref.load %arg1[%c16] : memref<27xf32, #tpu.memory_space<smem>>
    %85 = vector.broadcast %84 : f32 to vector<16x16xf32>
    %86 = arith.mulf %85, %37 : vector<16x16xf32>
    %87 = arith.addf %83, %86 : vector<16x16xf32>
    %c17 = arith.constant 17 : index
    %88 = memref.load %arg1[%c17] : memref<27xf32, #tpu.memory_space<smem>>
    %89 = vector.broadcast %88 : f32 to vector<16x16xf32>
    %90 = arith.mulf %89, %53 : vector<16x16xf32>
    %91 = arith.addf %87, %90 : vector<16x16xf32>
    %c22 = arith.constant 22 : index
    %92 = memref.load %arg1[%c22] : memref<27xf32, #tpu.memory_space<smem>>
    %93 = vector.broadcast %92 : f32 to vector<16x16xf32>
    %94 = arith.addf %91, %93 : vector<16x16xf32>
    %c22_27 = arith.constant 22 : index
    %95 = memref.load %arg1[%c22_27] : memref<27xf32, #tpu.memory_space<smem>>
    %96 = vector.broadcast %95 : f32 to vector<20x20xf32>
    %c0_28 = arith.constant 0 : index
    %c1_29 = arith.constant 1 : index
    %c0_30 = arith.constant 0 : index
    %c0_31 = arith.constant 0 : index
    %97 = vector.load %arg3[%c0_28, %c1_29, %c0_30, %c0_31] : memref<1x3x20x20xf32, #tpu.memory_space<vmem>>, vector<1x1x20x20xf32>
    %98 = vector.shape_cast %97 : vector<1x1x20x20xf32> to vector<20x20xf32>
    %99 = vector.shape_cast %96 : vector<20x20xf32> to vector<1x1x20x20xf32>
    tpu.vector_store %arg3[%c0_28, %c1_29, %c0_30, %c0_31], %99 {strides = array<i32>} : memref<1x3x20x20xf32, #tpu.memory_space<vmem>>, vector<1x1x20x20xf32>,
    %c25 = arith.constant 25 : index
    %100 = memref.load %arg1[%c25] : memref<27xf32, #tpu.memory_space<smem>>
    %101 = vector.broadcast %100 : f32 to vector<18x18xf32>
    %c0_32 = arith.constant 0 : index
    %c1_33 = arith.constant 1 : index
    %c1_34 = arith.constant 1 : index
    %c1_35 = arith.constant 1 : index
    %102 = vector.load %arg3[%c0_32, %c1_33, %c1_34, %c1_35] : memref<1x3x20x20xf32, #tpu.memory_space<vmem>>, vector<1x1x18x18xf32>
    %103 = vector.shape_cast %102 : vector<1x1x18x18xf32> to vector<18x18xf32>
    %104 = vector.shape_cast %101 : vector<18x18xf32> to vector<1x1x18x18xf32>
    tpu.vector_store %arg3[%c0_32, %c1_33, %c1_34, %c1_35], %104 {strides = array<i32>} : memref<1x3x20x20xf32, #tpu.memory_space<vmem>>, vector<1x1x18x18xf32>,
    %c0_36 = arith.constant 0 : index
    %c1_37 = arith.constant 1 : index
    %c2_38 = arith.constant 2 : index
    %c2_39 = arith.constant 2 : index
    %105 = vector.load %arg3[%c0_36, %c1_37, %c2_38, %c2_39] : memref<1x3x20x20xf32, #tpu.memory_space<vmem>>, vector<1x1x16x16xf32>
    %106 = vector.shape_cast %105 : vector<1x1x16x16xf32> to vector<16x16xf32>
    %107 = vector.shape_cast %94 : vector<16x16xf32> to vector<1x1x16x16xf32>
    tpu.vector_store %arg3[%c0_36, %c1_37, %c2_38, %c2_39], %107 {strides = array<i32>} : memref<1x3x20x20xf32, #tpu.memory_space<vmem>>, vector<1x1x16x16xf32>,
    %c18 = arith.constant 18 : index
    %108 = memref.load %arg1[%c18] : memref<27xf32, #tpu.memory_space<smem>>
    %109 = vector.broadcast %108 : f32 to vector<16x16xf32>
    %110 = arith.mulf %109, %21 : vector<16x16xf32>
    %c19 = arith.constant 19 : index
    %111 = memref.load %arg1[%c19] : memref<27xf32, #tpu.memory_space<smem>>
    %112 = vector.broadcast %111 : f32 to vector<16x16xf32>
    %113 = arith.mulf %112, %37 : vector<16x16xf32>
    %114 = arith.addf %110, %113 : vector<16x16xf32>
    %c20 = arith.constant 20 : index
    %115 = memref.load %arg1[%c20] : memref<27xf32, #tpu.memory_space<smem>>
    %116 = vector.broadcast %115 : f32 to vector<16x16xf32>
    %117 = arith.mulf %116, %53 : vector<16x16xf32>
    %118 = arith.addf %114, %117 : vector<16x16xf32>
    %c23 = arith.constant 23 : index
    %119 = memref.load %arg1[%c23] : memref<27xf32, #tpu.memory_space<smem>>
    %120 = vector.broadcast %119 : f32 to vector<16x16xf32>
    %121 = arith.addf %118, %120 : vector<16x16xf32>
    %c23_40 = arith.constant 23 : index
    %122 = memref.load %arg1[%c23_40] : memref<27xf32, #tpu.memory_space<smem>>
    %123 = vector.broadcast %122 : f32 to vector<20x20xf32>
    %c0_41 = arith.constant 0 : index
    %c2_42 = arith.constant 2 : index
    %c0_43 = arith.constant 0 : index
    %c0_44 = arith.constant 0 : index
    %124 = vector.load %arg3[%c0_41, %c2_42, %c0_43, %c0_44] : memref<1x3x20x20xf32, #tpu.memory_space<vmem>>, vector<1x1x20x20xf32>
    %125 = vector.shape_cast %124 : vector<1x1x20x20xf32> to vector<20x20xf32>
    %126 = vector.shape_cast %123 : vector<20x20xf32> to vector<1x1x20x20xf32>
    tpu.vector_store %arg3[%c0_41, %c2_42, %c0_43, %c0_44], %126 {strides = array<i32>} : memref<1x3x20x20xf32, #tpu.memory_space<vmem>>, vector<1x1x20x20xf32>,
    %c26 = arith.constant 26 : index
    %127 = memref.load %arg1[%c26] : memref<27xf32, #tpu.memory_space<smem>>
    %128 = vector.broadcast %127 : f32 to vector<18x18xf32>
    %c0_45 = arith.constant 0 : index
    %c2_46 = arith.constant 2 : index
    %c1_47 = arith.constant 1 : index
    %c1_48 = arith.constant 1 : index
    %129 = vector.load %arg3[%c0_45, %c2_46, %c1_47, %c1_48] : memref<1x3x20x20xf32, #tpu.memory_space<vmem>>, vector<1x1x18x18xf32>
    %130 = vector.shape_cast %129 : vector<1x1x18x18xf32> to vector<18x18xf32>
    %131 = vector.shape_cast %128 : vector<18x18xf32> to vector<1x1x18x18xf32>
    tpu.vector_store %arg3[%c0_45, %c2_46, %c1_47, %c1_48], %131 {strides = array<i32>} : memref<1x3x20x20xf32, #tpu.memory_space<vmem>>, vector<1x1x18x18xf32>,
    %c0_49 = arith.constant 0 : index
    %c2_50 = arith.constant 2 : index
    %c2_51 = arith.constant 2 : index
    %c2_52 = arith.constant 2 : index
    %132 = vector.load %arg3[%c0_49, %c2_50, %c2_51, %c2_52] : memref<1x3x20x20xf32, #tpu.memory_space<vmem>>, vector<1x1x16x16xf32>
    %133 = vector.shape_cast %132 : vector<1x1x16x16xf32> to vector<16x16xf32>
    %134 = vector.shape_cast %121 : vector<16x16xf32> to vector<1x1x16x16xf32>
    tpu.vector_store %arg3[%c0_49, %c2_50, %c2_51, %c2_52], %134 {strides = array<i32>} : memref<1x3x20x20xf32, #tpu.memory_space<vmem>>, vector<1x1x16x16xf32>,
    return
  }
  func.func @transform_0(%arg0: i32) -> i32 {
    %c0_i32 = arith.constant 0 : i32
    %c0_i32_0 = arith.constant 0 : i32
    return %c0_i32 : i32
  }
  func.func @transform_1(%arg0: i32) -> (i32, i32, i32, i32) {
    %c0_i32 = arith.constant 0 : i32
    %c0_i32_0 = arith.constant 0 : i32
    %c0_i32_1 = arith.constant 0 : i32
    %c0_i32_2 = arith.constant 0 : i32
    return %arg0, %c0_i32, %c0_i32_0, %c0_i32_1 : i32, i32, i32, i32
  }
  func.func @transform_2(%arg0: i32) -> (i32, i32, i32, i32) {
    %c0_i32 = arith.constant 0 : i32
    %c0_i32_0 = arith.constant 0 : i32
    %c0_i32_1 = arith.constant 0 : i32
    %c0_i32_2 = arith.constant 0 : i32
    return %arg0, %c0_i32, %c0_i32_0, %c0_i32_1 : i32, i32, i32, i32
  }
}

</mosaic_0001>

<bundles_post_ra>
// kernel: squeeze.4
= control target key start
LH: loop header
LB: loop body
LE: loop exit
PB: predicated region body
PF: predicated region fallthrough
CT: control target
= control target key end

     0   :  { %vm7_vm0 = vcmask 23552   ;;  %s30_s8 = smov 3   ;;  %vm13_vm1 = vcmask 72752   ;;  %vm19_vm2 = vcmask 48152   ;;  %s47_s0 = inlined_call_operand.vmem [shape: f32[3,3], index: 0, kind: input, shape index: {}]   ;;  %s48_s1 = inlined_call_operand.vmem [shape: f32[9], index: 1, kind: output, shape index: {}]  }
   0x1   :  { %v4_v0 = vld [vmem:[%s47_s0] sm:$0xf]  ;;  %s29_s0 = smov 6  }
   0x2   :  { %5 = vst [vmem:[#allocation1] sm:$0xf] %v4_v0 }
   0x9   :  { %v10_v1 = vld [vmem:[#allocation1 + $0x2] sm:$0x1]   ;;  %v6_v2 = vld [vmem:[#allocation1] sm:$0x1]   ;;  %v16_v3 = vld [vmem:[#allocation1 + $0x1] sm:$0x1]  }
   0xa   :  { %11 = vrot.lane.b32.xlu0 %v10_v1, %s29_s0  ;;  %8 = vst.msk [vmem:[#allocation0] sm:$0x1] %vm7_vm0, %v6_v2  }
   0xe   :  { %17 = vrot.lane.b32.xlu0 %v16_v3, %s30_s8 }
  0x7c   :  { %v12_v4 = vpop.permute.xlu0 %11  }
  0x7d   :  { %14 = vst.msk [vmem:[#allocation0] sm:$0x1] %vm13_vm1, %v12_v4  }
  0x80   :  { %v18_v5 = vpop.permute.xlu0 %17  }
  0x81   :  { %20 = vst.msk [vmem:[#allocation0] sm:$0x1] %vm19_vm2, %v18_v5  }
  0x88   :  { %v24_v6 = vld [vmem:[#allocation0] sm:$0x1] }
  0x89   :  { %26 = vst [vmem:[%s48_s1] sm:$0x1] %v24_v6 }

// kernel: block_forward.1
= control target key start
LH: loop header
LB: loop body
LE: loop exit
PB: predicated region body
PF: predicated region fallthrough
CT: control target
= control target key end

     0   :  { %7 = vsyncpa [#allocation4], 0  ;;  %s931_s0 = inlined_call_operand.vmem [shape: f32[27], index: 0, kind: input, shape index: {}]   ;;  %s932_s1 = inlined_call_operand.hbm [shape: f32[2,3,16,16], index: 1, kind: input, shape index: {}]   ;;  %s933_s2 = inlined_call_operand.vmem [shape: f32[2,3,20,20], index: 2, kind: output, shape index: {}]  }
   0x1   :  { %8 = vsyncpa [#allocation3], 0 }
   0x2   :  { %10 = vsyncpa [#allocation3 + $0x1], 0  ;;  %s670_s9 = smov 0   ;;  %s672_s10 = smov 0  }
   0x3   :  { %s674_s11 = smov 0   ;;  %s676_s12 = smov 0  }
   0x4 LB: > { %s689_s13 = sadd.s32 4294967295, %s648_s12   ;;  %s692_s14 = sadd.s32 1, %s648_s12   ;;  %s648_s12 = sphi %s676_s12, %s946_s12   ;;  %s644_s11 = sphi %s674_s11, %s945_s11   ;;  %s640_s10 = sphi %s672_s10, %s944_s10   ;;  %s636_s9 = sphi %s670_s9, %s943_s9  }
   0x5   : > { %s41_s15 = ssub.s32 %s648_s12, %s692_s14  ;;  %s44_s16 = sadd.s32 1, %s644_s11 }
   0x6   : > { %p42_p0 = scmp.eq.s32.totalorder %s41_s15, 0  ;;  %p51_p1 = scmp.ne.s32.totalorder %s644_s11, %s640_s10 }
   0x7   : > { %p52_p2 = scmp.eq.s32.totalorder %s648_s12, 0  ;;  %p57_p3 = scmp.ne.s32.totalorder %s640_s10, %s636_s9 }
   0x8   : > { %s702_s17 = scalar_select %p42_p0, %s644_s11, %s44_s16  }
   0x9   : > { %p53_p4 = por %p52_p2, %p51_p1  ;;  %p935_p5 = scmp.eq.s32.totalorder %s689_s13, 0 }
   0xa   : > { %p453_p6 = scmp.ge.s32.totalorder %s648_s12, 1  ;;  %p94_p7 = scmp.lt.s32.totalorder %s648_s12, 3 }
   0xb   : > { %p709_p8 = por %p935_p5, %p57_p3  ;;  %s107_s22 = sshll.u32 %s931_s0, 4  ;;  %s108_s22 = int_to_ptr.vmem [resolvable:$true] %s107_s22 }
   0xc   : > { %p713_p9 = pnand %p453_p6, %p94_p7  ;;  %p527_p11 = scmp.lt.s32.totalorder %s648_s12, 2 }
   0xd   : > { %s936_s18 = scalar_select %p709_p8, 1, 0 }
   0xe   : > { %p518_p10 = pneg %p713_p9  ;;  %s118_s23 = sand.u32 1, %s644_s11  }
   0xf   : > { %p730_p13 = pnand %p527_p11, %p53_p4  ;;  %s508_s26 = smul.u32 48, %s118_s23 }
  0x10   : > { %p726_p12 = pnand %p518_p10, %p935_p5  ;;  %s509_s27 = smul.u32 768, %s648_s12 }
  0x11   : > { %s565_s28 = scalar_lea.vmem %s108_s22, 16  ;;  %p573_p6 = scmp.lt.s32.totalorder %s108_s22, %s108_s22 }
  0x12   : > { %p566_p0 = scmp.ne.s32.totalorder %s108_s22, %s565_s28  ;;  %p567_p1 = pneg %p726_p12 }
  0x13   : > { %p574_p7 = scmp.lt.s32.totalorder %s565_s28, %s565_s28 }
  0x14   : > { %p568_p2 = pnand %p567_p1, %p566_p0 }
  0x15   : > { %p575_p8 = por %p574_p7, %p573_p6 }
  0x16   : > { %p569_p3 = pneg %p568_p2 }
  0x18   : > { %p576_p10 = pnand %p575_p8, %p569_p3 }
  0x1a   : > { %579 = shalt.err (!%p576_p10)
}
  0x1b   : > { %s650_s29 = smov [#allocation2]   ;;  %s742_s4 = scalar_lea.hbm %s932_s1, %s509_s27 }
  0x1c   : > { %521 = dma.vmem_to_smem (!%p726_p12), %s108_s22, 16, %s650_s29, [#allocation4]  }
  0x1d   : > { %s122_s5 = scalar_lea.vmem [#allocation5], %s508_s26  ;;  %s746_s7 = scalar_lea.sflag [#allocation3], %s118_s23 }
  0x1e   : > { %s129_s6 = sshll.u32 %s122_s5, 4  ;;  %s580_s8 = scalar_lea.hbm %s742_s4, 768  ;;  %s744_s6 = int_to_ptr.vmem [resolvable:$true] %s129_s6 }
  0x1f   : > { %p581_p4 = scmp.ne.s32.totalorder %s742_s4, %s580_s8  ;;  %p582_p8 = pneg %p730_p13 }
  0x20   : > { %s585_s15 = scalar_lea.hbm %s932_s1, 1536  ;;  %p586_p0 = scmp.lt.u32.totalorder %s742_s4, %s932_s1 }
  0x21   : > { %p583_p11 = pnand %p582_p8, %p581_p4  ;;  %p587_p1 = scmp.lt.u32.totalorder %s585_s15, %s580_s8 }
  0x22   : > { %p589_p3 = scmp.lt.u32.totalorder %s580_s8, %s742_s4 }
  0x23   : > { %p584_p12 = pneg %p583_p11  ;;  %p588_p2 = por %p587_p1, %p586_p0 }
  0x25   : > { %p590_p6 = por %p589_p3, %p588_p2 }
  0x27   : > { %p591_p7 = pnand %p590_p6, %p584_p12 }
  0x29   : > { %594 = shalt.err (!%p591_p7)
}
  0x2a   : > { %s595_s21 = scalar_lea.vmem %s744_s6, 768  ;;  %s651_s22 = smov [#allocation5]  }
  0x2b   : > { %p596_p10 = scmp.ne.s32.totalorder %s744_s6, %s595_s21  ;;  %s600_s23 = sshll.u32 %s651_s22, 4  ;;  %s601_s23 = int_to_ptr.vmem [resolvable:$false] %s600_s23 }
  0x2c   : > { %s602_s24 = scalar_lea.vmem %s601_s23, 1536  ;;  %p603_p5 = scmp.lt.s32.totalorder %s744_s6, %s601_s23 }
  0x2d   : > { %p598_p4 = pnand %p596_p10, %p582_p8  ;;  %p604_p0 = scmp.lt.s32.totalorder %s602_s24, %s595_s21 }
  0x2f   : > { %p599_p11 = pneg %p598_p4  ;;  %p605_p1 = por %p604_p0, %p603_p5 }
  0x31   : > { %p606_p2 = pnand %p605_p1, %p599_p11 }
  0x33   : > { %609 = shalt.err (!%p606_p2)
}
  0x34   : > { %s652_s26 = smov 128   ;;  %s653_s27 = smov 8  }
  0x35   : > { %525 = dma.hbm_to_vmem [thread:$0]  (!%p730_p13), %s742_s4, 768, %s744_s6, %s746_s7, %s652_s26, %s652_s26, %s653_s27  }
  0x36   : > { %141 = sbr.rel (%p713_p9) target bundleno = 225 (0xe1), region = 28  ;;  %p940_p8 = scmp.eq.s32.totalorder (!%p713_p9), %s689_s13, 0 }
  0x3d   : > { %627 = dma.done.wait (%p940_p8), [#allocation4], 16   ;;  %p941_p12 = pmov %p940_p8 }
  0x3e   : > { %s147_s28 = sand.u32 1, %s640_s10   ;;  %p942_p5 = scmp.ne.s32.totalorder %s936_s18, 0 }
  0x3f   : > { %629 = vsyncadd (%p941_p12), [#allocation4], 4294967280  ;;  %s510_s29 = smul.u32 48, %s147_s28  ;;  %s148_s30 = scalar_lea.sflag [#allocation3], %s147_s28 }
  0x41   : > { %s151_s3 = scalar_lea.vmem [#allocation5], %s510_s29 }
  0x42   : > { %631 = dma.done.wait (%p942_p5), %s148_s30, 768  }
  0x43   : > { %633 = vsyncadd (%p942_p5), %s148_s30, 4294966528 }
  0x44   : > { %156 = sfence }
  0x45   : > { %s186_s19 = sld [smem:[#allocation2]]  ;;  %s464_s25 = sld [smem:[#allocation2 + $0x1]]  ;;  %v178_v0 = vld [vmem:[%s151_s3] sm:$0xff]  ;;  %v179_v1 = vld [vmem:[%s151_s3 + $0x8] sm:$0xff]  ;;  %v460_v2 = vld [vmem:[%s151_s3 + $0x10] sm:$0xff]  ;;  %vm272_vm0 = vcmask 162816  }
  0x46   : > { %s465_s4 = sld [smem:[#allocation2 + $0x2]]  ;;  %s785_s5 = sld [smem:[#allocation2 + $0x9]]  ;;  %v461_v3 = vld [vmem:[%s151_s3 + $0x18] sm:$0xff]  ;;  %v797_v4 = vld [vmem:[%s151_s3 + $0x20] sm:$0xff]  ;;  %v799_v5 = vld [vmem:[%s151_s3 + $0x28] sm:$0xff]  ;;  %vm275_vm1 = vcmask 158720  }
  0x47   : > { %s467_s6 = sld [smem:[#allocation2 + $0x3]]  ;;  %s787_s7 = sld [smem:[#allocation2 + $0x4]]  ;;  %vm279_vm2 = vcmask 154632   ;;  %vm282_vm3 = vcmask 148488   ;;  %vm292_vm4 = vcmask 146448  }
  0x48   : > { %s789_s8 = sld [smem:[#allocation2 + $0x5]]  ;;  %s791_s9 = sld [smem:[#allocation2 + $0xa]] }
  0x49   : > { %s793_s18 = sld [smem:[#allocation2 + $0x6]]  ;;  %s795_s12 = sld [smem:[#allocation2 + $0x7]] }
  0x4a   : > { %s802_s15 = sld [smem:[#allocation2 + $0x8]]  ;;  %s804_s16 = sld [smem:[#allocation2 + $0xb]] }
  0x4b   : > { %v187_v6 = vstv %s186_s19  ;;  %v191_v9 = vstv %s464_s25  ;;  %p173_p9 = scmp.lt.s32.totalorder %s689_s13, 1  ;;  %s810_s20 = sld [smem:[#allocation2 + $0xf]] }
  0x4c   : > { %v188_v7 = vmul.f32 %v187_v6, %v178_v0  ;;  %v189_v8 = vmul.f32 %v187_v6, %v179_v1  ;;  %v192_v10 = vmul.f32 %v460_v2, %v191_v9  ;;  %v193_v11 = vmul.f32 %v461_v3, %v191_v9  ;;  %s812_s21 = sld [smem:[#allocation2 + $0x10]]  ;;  %s821_s22 = sld [smem:[#allocation2 + $0x11]] }
  0x4d   : > { %v197_v12 = vstv %s465_s4  ;;  %v203_v13 = vstv %s785_s5  ;;  %v209_v16 = vstv %s467_s6  ;;  %v213_v17 = vstv %s787_s7  ;;  %s948_s13 = smov (!%p173_p9, %s689_s13), 1  ;;  %s823_s23 = sld [smem:[#allocation2 + $0x16]] }
  0x4e   : > { %v198_v14 = vmul.f32 %v797_v4, %v197_v12  ;;  %v199_v15 = vmul.f32 %v799_v5, %v197_v12  ;;  %v194_v18 = vadd.f32 %v192_v10, %v188_v7  ;;  %v195_v19 = vadd.f32 %v193_v11, %v189_v8  ;;  %s827_s24 = sld [smem:[#allocation2 + $0xc]]  ;;  %s829_s26 = sld [smem:[#allocation2 + $0xd]] }
  0x4f   : > { %v210_v20 = vmul.f32 %v209_v16, %v178_v0  ;;  %v211_v21 = vmul.f32 %v209_v16, %v179_v1  ;;  %v214_v22 = vmul.f32 %v460_v2, %v213_v17  ;;  %v215_v23 = vmul.f32 %v461_v3, %v213_v17  ;;  %s511_s27 = smul.u32 72, %s948_s13  ;;  %s832_s28 = sld [smem:[#allocation2 + $0xe]] }
  0x50   : > { %v219_v24 = vstv %s789_s8  ;;  %v225_v25 = vstv %s791_s9  ;;  %v200_v26 = vadd.f32 %v198_v14, %v194_v18  ;;  %v201_v27 = vadd.f32 %v199_v15, %v195_v19  ;;  %s838_s29 = sld [smem:[#allocation2 + $0x15]]  ;;  %s840_s13 = sld [smem:[#allocation2 + $0x12]] }
  0x51   : > { %v220_v28 = vmul.f32 %v797_v4, %v219_v24  ;;  %v221_v29 = vmul.f32 %v799_v5, %v219_v24  ;;  %v216_v30 = vadd.f32 %v214_v22, %v210_v20  ;;  %v217_v31 = vadd.f32 %v215_v23, %v211_v21  ;;  %s842_s30 = sld [smem:[#allocation2 + $0x13]]  ;;  %s851_s25 = scalar_lea.vmem %s933_s2, %s511_s27 }
  0x52   : > { %v231_v32 = vstv %s793_s18  ;;  %v235_v33 = vstv %s795_s12  ;;  %v204_v34 = vadd.f32 %v203_v13, %v200_v26  ;;  %v205_v35 = vadd.f32 %v203_v13, %v201_v27  ;;  %s854_s4 = sld [smem:[#allocation2 + $0x14]]  ;;  %s856_s5 = sld [smem:[#allocation2 + $0x17]] }
  0x53   : > { %v232_v36 = vmul.f32 %v231_v32, %v178_v0  ;;  %v233_v37 = vmul.f32 %v231_v32, %v179_v1  ;;  %v222_v38 = vadd.f32 %v220_v28, %v216_v30  ;;  %v223_v39 = vadd.f32 %v221_v29, %v217_v31  ;;  %s870_s6 = sld [smem:[#allocation2 + $0x19]]  ;;  %s873_s7 = sld [smem:[#allocation2 + $0x18]] }
  0x54   : > { %v236_v40 = vmul.f32 %v460_v2, %v235_v33  ;;  %v237_v41 = vmul.f32 %v461_v3, %v235_v33  ;;  %v834_v42 = vmax.f32 %v204_v34, 0.0  ;;  %v207_v43 = vmax.f32 %v205_v35, 0.0  ;;  %s875_s8 = sld [smem:[#allocation2 + $0x1a]]  ;;  %s654_s9 = smov 2  }
  0x55   : > { %v241_v44 = vstv %s802_s15  ;;  %v247_v45 = vstv %s804_s16  ;;  %v226_v46 = vadd.f32 %v225_v25, %v222_v38  ;;  %v227_v47 = vadd.f32 %v225_v25, %v223_v39 }
  0x56   : > { %v238_v48 = vadd.f32 %v236_v40, %v232_v36  ;;  %v239_v49 = vadd.f32 %v237_v41, %v233_v37  ;;  %v242_v50 = vmul.f32 %v797_v4, %v241_v44  ;;  %v243_v51 = vmul.f32 %v799_v5, %v241_v44 }
  0x57   : > { %v296_v52 = vstv %s810_s20  ;;  %v300_v53 = vstv %s812_s21  ;;  %v228_v54 = vmax.f32 %v226_v46, 0.0  ;;  %v229_v55 = vmax.f32 %v227_v47, 0.0 }
  0x58   : > { %v297_v56 = vmul.f32 %v296_v52, %v834_v42  ;;  %v298_v57 = vmul.f32 %v296_v52, %v207_v43  ;;  %v244_v58 = vadd.f32 %v242_v50, %v238_v48  ;;  %v245_v59 = vadd.f32 %v243_v51, %v239_v49 }
  0x59   : > { %v306_v60 = vstv %s821_s22  ;;  %v312_v61 = vstv %s823_s23  ;;  %v301_v62 = vmul.f32 %v300_v53, %v228_v54  ;;  %v302_v63 = vmul.f32 %v300_v53, %v229_v55 }
  0x5a   : > { %484 = vst.msk [vmem:[%s851_s25 + $0x18] sm:$0xff] %vm272_vm0, %v312_v61  ;;  %485 = vst.msk [vmem:[%s851_s25 + $0x20] sm:$0xff] %vm272_vm0, %v312_v61  ;;  %v253_v0 = vstv %s827_s24  ;;  %v257_v1 = vstv %s829_s26  ;;  %v248_v2 = vadd.f32 %v247_v45, %v244_v58  ;;  %v249_v3 = vadd.f32 %v247_v45, %v245_v59 }
  0x5b   : > { %486 = vst.msk [vmem:[%s851_s25 + $0x28] sm:$0xf] %vm275_vm1, %v312_v61  ;;  %v254_v4 = vmul.f32 %v253_v0, %v834_v42  ;;  %v255_v5 = vmul.f32 %v253_v0, %v207_v43  ;;  %v303_v6 = vadd.f32 %v301_v62, %v297_v56  ;;  %v258_v7 = vmul.f32 %v257_v1, %v228_v54 }
  0x5c   : > { %v259_v8 = vmul.f32 %v257_v1, %v229_v55  ;;  %v263_v9 = vstv %s832_s28  ;;  %v250_v10 = vmax.f32 %v248_v2, 0.0  ;;  %v251_v11 = vmax.f32 %v249_v3, 0.0 }
  0x5d   : > { %v269_v12 = vstv %s838_s29  ;;  %v304_v13 = vadd.f32 %v302_v63, %v298_v57  ;;  %v260_v14 = vadd.f32 %v258_v7, %v254_v4  ;;  %v335_v16 = vstv %s840_s13 }
  0x5e   : > { %273 = vst.msk [vmem:[%s851_s25] sm:$0xff] %vm272_vm0, %v269_v12  ;;  %274 = vst.msk [vmem:[%s851_s25 + $0x8] sm:$0xff] %vm272_vm0, %v269_v12  ;;  %v261_v15 = vadd.f32 %v259_v8, %v255_v5  ;;  %v339_v17 = vstv %s842_s30  ;;  %v307_v18 = vmul.f32 %v306_v60, %v250_v10  ;;  %v308_v19 = vmul.f32 %v306_v60, %v251_v11 }
  0x5f   : > { %276 = vst.msk [vmem:[%s851_s25 + $0x10] sm:$0xf] %vm275_vm1, %v269_v12  ;;  %v264_v20 = vmul.f32 %v263_v9, %v250_v10  ;;  %v265_v21 = vmul.f32 %v263_v9, %v251_v11  ;;  %v337_v22 = vmul.f32 %v335_v16, %v207_v43  ;;  %v341_v23 = vmul.f32 %v339_v17, %v229_v55 }
  0x60   : > { %v345_v24 = vstv %s854_s4  ;;  %v351_v25 = vstv %s856_s5  ;;  %v309_v26 = vadd.f32 %v307_v18, %v303_v6  ;;  %v310_v28 = vadd.f32 %v308_v19, %v304_v13 }
  0x61   : > { %v266_v27 = vadd.f32 %v264_v20, %v260_v14  ;;  %v267_v29 = vadd.f32 %v265_v21, %v261_v15  ;;  %497 = vst.msk [vmem:[%s851_s25 + $0x30] sm:$0xff] %vm272_vm0, %v351_v25  ;;  %498 = vst.msk [vmem:[%s851_s25 + $0x38] sm:$0xff] %vm272_vm0, %v351_v25  ;;  %v343_v30 = vadd.f32 %v341_v23, %v337_v22  ;;  %v320_v40 = vstv %s870_s6 }
  0x62   : > { %499 = vst.msk [vmem:[%s851_s25 + $0x40] sm:$0xf] %vm275_vm1, %v351_v25  ;;  %v347_v31 = vmul.f32 %v345_v24, %v251_v11  ;;  %v336_v32 = vmul.f32 %v335_v16, %v834_v42  ;;  %v340_v33 = vmul.f32 %v339_v17, %v228_v54  ;;  %v313_v34 = vadd.f32 %v312_v61, %v309_v26 }
  0x63   : > { %v270_v35 = vadd.f32 %v269_v12, %v266_v27  ;;  %v314_v36 = vadd.f32 %v312_v61, %v310_v28  ;;  %v271_v37 = vadd.f32 %v269_v12, %v267_v29  ;;  %v346_v39 = vmul.f32 %v345_v24, %v250_v10  ;;  %488 = vst.msk [vmem:[%s851_s25 + $0x19] sm:$0xff] %vm279_vm2, %v320_v40 }
  0x64   : > { %v342_v38 = vadd.f32 %v340_v33, %v336_v32  ;;  %326 = vrot.lane.b32.xlu1 %v313_v34, %s654_s9  ;;  %v349_v41 = vadd.f32 %v347_v31, %v343_v30  ;;  %489 = vst.msk [vmem:[%s851_s25 + $0x21] sm:$0xff] %vm279_vm2, %v320_v40  ;;  %v278_v42 = vstv %s873_s7  ;;  %v359_v43 = vstv %s875_s8 }
  0x65   : > { %286 = vrot.lane.b32.xlu0 %v270_v35, %s654_s9  ;;  %280 = vst.msk [vmem:[%s851_s25 + $0x1] sm:$0xff] %vm279_vm2, %v278_v42  ;;  %281 = vst.msk [vmem:[%s851_s25 + $0x9] sm:$0xff] %vm279_vm2, %v278_v42 }
  0x66   : > { %v348_v44 = vadd.f32 %v346_v39, %v342_v38  ;;  %490 = vst.msk [vmem:[%s851_s25 + $0x29] sm:$0x3] %vm282_vm3, %v320_v40  ;;  %283 = vst.msk [vmem:[%s851_s25 + $0x11] sm:$0x3] %vm282_vm3, %v278_v42  ;;  %v353_v45 = vadd.f32 %v351_v25, %v349_v41 }
  0x67   : > { %502 = vst.msk [vmem:[%s851_s25 + $0x39] sm:$0xff] %vm279_vm2, %v359_v43  ;;  %501 = vst.msk [vmem:[%s851_s25 + $0x31] sm:$0xff] %vm279_vm2, %v359_v43 }
  0x68   : > { %503 = vst.msk [vmem:[%s851_s25 + $0x41] sm:$0x3] %vm282_vm3, %v359_v43  ;;  %328 = vrot.lane.b32.xlu1 %v314_v36, %s654_s9  ;;  %v352_v46 = vadd.f32 %v351_v25, %v348_v44 }
  0x69   : > { %288 = vrot.lane.b32.xlu0 %v271_v37, %s654_s9 }
  0x6c   : > { %367 = vrot.lane.b32.xlu1 %v353_v45, %s654_s9 }
  0x6d   : > { %365 = vrot.lane.b32.xlu0 %v352_v46, %s654_s9 }
  0xd6   : > { %v327_v47 = vpop.permute.xlu1 %326 }
  0xd7   : > { %v287_v48 = vpop.permute.xlu0 %286  ;;  %491 = vst.msk [vmem:[%s851_s25 + $0x1a] sm:$0xff] %vm292_vm4, %v327_v47 }
  0xd8   : > { %293 = vst.msk [vmem:[%s851_s25 + $0x2] sm:$0xff] %vm292_vm4, %v287_v48 }
  0xda   : > { %v329_v49 = vpop.permute.xlu1 %328 }
  0xdb   : > { %v289_v50 = vpop.permute.xlu0 %288  ;;  %492 = vst.msk [vmem:[%s851_s25 + $0x22] sm:$0xff] %vm292_vm4, %v329_v49 }
  0xdc   : > { %294 = vst.msk [vmem:[%s851_s25 + $0xa] sm:$0xff] %vm292_vm4, %v289_v50 }
  0xde   : > { %v368_v51 = vpop.permute.xlu1 %367 }
  0xdf   : > { %v366_v52 = vpop.permute.xlu0 %365  ;;  %505 = vst.msk [vmem:[%s851_s25 + $0x3a] sm:$0xff] %vm292_vm4, %v368_v51 }
  0xe0   : > { %504 = vst.msk [vmem:[%s851_s25 + $0x32] sm:$0xff] %vm292_vm4, %v366_v52 }
  0xe1 PF: > { %p13_p13 = scmp.ge.s32.totalorder %s692_s14, 4   ;;  %s943_s9 = smov %s640_s10 }
  0xe2   : > { %s944_s10 = smov %s644_s11  ;;  %s945_s11 = smov %s702_s17 }
  0xe3   : > { %s946_s12 = smov %s692_s14  ;;  %15 = sbr.rel (!%p13_p13) target bundleno = 4 (0x4), region = 77 }
  0xea   :  { %394 = vsyncpa [#allocation3], 1 }
  0xeb   :  { %396 = vsyncpa [#allocation3 + $0x1], 1 }
  0xec   :  { %397 = vsyncpa [#allocation4], 1 }
  0xed   :  { %399 = vsyncpa [#allocation4 + $0x1], 1 }

</bundles_post_ra>
